<compile_context>
chip_gen: v7x
topology: tpu7x:2x2x1
jax: 0.10.0
libtpu: 0.0.40
codegen_flags: <defaults>
</compile_context>

<pallas_src>
import jax
import jax.numpy as jnp
from jax.experimental import pallas as pl
from jax.experimental.pallas import tpu as pltpu

N_IN, H, N_OUT = 2, 25, 1          # Network(): 2 -> 25 -> 25 -> 25 -> 1
EPSILON = 0.1                      # Linear init: W ~ N(0, 0.1), b = 0


def mlp_kernel(x_ref,
               w1_ref, b1_ref,
               w2_ref, b2_ref,
               w3_ref, b3_ref,
               w4_ref, b4_ref,
               o_ref):
    """One batch tile. All activations are (features, tile_b): batch on lanes."""
    # Explicit f32 upcast before VPU work (v5e VPU/EUP have no bf16).
    x = x_ref[...].astype(jnp.float32)              # (N_IN, tile_b)
    w1 = w1_ref[...].astype(jnp.float32)            # (H, N_IN)

    # Layer 1: K=2 contraction as two broadcast FMAs on the VPU
    # (a 2-deep matmul wastes the MXU and still pays push/pop latency).
    h = w1[:, 0:1] * x[0:1, :] + w1[:, 1:2] * x[1:2, :] + b1_ref[...]
    h = jnp.maximum(h, 0.0)                         # ReLU, f32

    def dense(h, w_ref, b_ref):                     # (n_out, n_in) @ (n_in, tile_b)
        return jnp.dot(w_ref[...], h.astype(w_ref.dtype),
                       preferred_element_type=jnp.float32) + b_ref[...]

    h = jnp.maximum(dense(h, w2_ref, b2_ref), 0.0)
    h = jnp.maximum(dense(h, w3_ref, b3_ref), 0.0)
    logits = dense(h, w4_ref, b4_ref)               # (1, tile_b) f32

    # Numerically stable sigmoid: exp argument is always <= 0 (no overflow),
    # exp and the approx reciprocal both run on the otherwise-idle EUP.
    e = jnp.exp(-jnp.abs(logits))
    r = pl.reciprocal(1.0 + e, approx=True)
    o_ref[...] = jnp.where(logits >= 0, r, e * r)


def _tile_and_vmem_defaults():
    """Generation-aware batch-tile cap (lanes) and scoped-VMEM request (bytes)."""
    try:
        vmem_cap = getattr(pltpu.get_tpu_info(), "vmem_capacity_bytes",
                           64 * 2**20)
    except Exception:                                # unknown chip: be conservative
        vmem_cap = 64 * 2**20
    if vmem_cap <= 64 * 2**20:                       # v7x-class: 64 MiB physical
        return 8192, 40 * 2**20
    return 16384, 64 * 2**20                         # v5e / v6e: 128 MiB physical


def network_forward(x, params, *, tile_b=None, dtype=jnp.bfloat16):
    """x: (B, N_IN) float.  Returns (B, N_OUT) float32."""
    B = x.shape[0]
    tile_cap, vmem_limit = _tile_and_vmem_defaults()

    # Lane-dense batch tiling: tile is a multiple of 128 lanes.
    b_lanes = pl.cdiv(B, 128) * 128
    if tile_b is None:
        tile_b = tile_cap
    tile_b = max(128, (min(tile_b, tile_cap) // 128) * 128)
    if b_lanes >= 256:
        # Guarantee >= 2 grid steps so both v7x TensorCores get work.
        half = pl.cdiv(pl.cdiv(b_lanes, 2), 128) * 128
        tile_b = min(tile_b, half)
    else:
        tile_b = min(tile_b, b_lanes)
    B_pad = pl.cdiv(B, tile_b) * tile_b

    # Present x transposed: (N_IN, B_pad), batch on the lane axis.  The bf16
    # cast + transpose + pad fuse into a single XLA pass over x.
    x_t = jnp.pad(x.astype(dtype).T, ((0, 0), (0, B_pad - B)))

    # Weights transposed to (n_out, n_in); biases are (n_out, 1) f32 columns.
    w1 = params["w1"].astype(dtype).T
    w2 = params["w2"].astype(dtype).T
    w3 = params["w3"].astype(dtype).T
    w4 = params["w4"].astype(dtype).T
    b1, b2, b3, b4 = params["b1"], params["b2"], params["b3"], params["b4"]

    def full_spec(a):
        return pl.BlockSpec(a.shape, lambda i: (0, 0))

    itemsize = jnp.dtype(dtype).itemsize
    cost = pl.CostEstimate(
        flops=2 * B_pad * (H * N_IN + 2 * H * H + H * N_OUT),
        transcendentals=B_pad,                       # one exp per sample
        bytes_accessed=(N_IN * B_pad * itemsize
                        + (H * N_IN + 2 * H * H + H * N_OUT) * itemsize
                        + (3 * H + N_OUT) * 4
                        + N_OUT * B_pad * 4),
    )

    out_t = pl.pallas_call(
        mlp_kernel,
        out_shape=jax.ShapeDtypeStruct((N_OUT, B_pad), jnp.float32),
        grid_spec=pl.GridSpec(
            grid=(B_pad // tile_b,),
            in_specs=[
                pl.BlockSpec((N_IN, tile_b), lambda i: (0, i)),
                full_spec(w1), full_spec(b1),
                full_spec(w2), full_spec(b2),
                full_spec(w3), full_spec(b3),
                full_spec(w4), full_spec(b4),
            ],
            out_specs=pl.BlockSpec((N_OUT, tile_b), lambda i: (0, i)),
        ),
        compiler_params=pltpu.CompilerParams(
            dimension_semantics=("parallel",),
            vmem_limit_bytes=vmem_limit),
        cost_estimate=cost,
    )(x_t, w1, b1, w2, b2, w3, b3, w4, b4)

    # Slice + reshape (unit dim) back to (B, N_OUT); no transpose op needed.
    return out_t[0, :B].reshape(B, N_OUT)


def init_params(key):
    """Matches Linear.__init__: W ~ N(0, 0.1), b = 0.
    Biases are stored as (n_out, 1) columns for the lane-dense layout; the
    semantics are identical to PyTorch's 1-D zero bias."""
    k1, k2, k3, k4 = jax.random.split(key, 4)
    return {
        "w1": EPSILON * jax.random.normal(k1, (N_IN, H), jnp.float32),
        "b1": jnp.zeros((H, 1), jnp.float32),
        "w2": EPSILON * jax.random.normal(k2, (H, H), jnp.float32),
        "b2": jnp.zeros((H, 1), jnp.float32),
        "w3": EPSILON * jax.random.normal(k3, (H, H), jnp.float32),
        "b3": jnp.zeros((H, 1), jnp.float32),
        "w4": EPSILON * jax.random.normal(k4, (H, N_OUT), jnp.float32),
        "b4": jnp.zeros((N_OUT, 1), jnp.float32),
    }


def network_forward_ref(x, p):
    """Pure-JAX f32 reference of the forward pass (PyTorch convention x @ W + b)."""
    h = jnp.maximum(x @ p["w1"] + p["b1"].T, 0.0)
    h = jnp.maximum(h @ p["w2"] + p["b2"].T, 0.0)
    h = jnp.maximum(h @ p["w3"] + p["b3"].T, 0.0)
    return jax.nn.sigmoid(h @ p["w4"] + p["b4"].T)


# TODO(synk): Linear.backward / the in-place SGD parameter update (training
# step) is intentionally not implemented; this kernel covers forward only.

if __name__ == "__main__":
    key = jax.random.PRNGKey(0)
    pkey, xkey = jax.random.split(key)

    params = init_params(pkey)
    B = 16
    x = jax.random.uniform(xkey, (B, N_IN), jnp.float32)   # (batch, 2)

    out = jax.block_until_ready(network_forward(x, params))
    ref = network_forward_ref(x, params)

    assert out.shape == (B, N_OUT)
    # bf16 inputs/weights + EUP approx reciprocal -> looser tolerance than f32
    assert jnp.allclose(out, ref, atol=1e-2, rtol=0.0), \
        float(jnp.max(jnp.abs(out - ref)))

    print("KERNEL_OK")
</pallas_src>

<mosaic_0001>
module attributes {stable_mosaic.version = 11 : i64} {
  func.func @mlp_kernel(%arg0: i32, %arg1: memref<2x128xbf16, #tpu.memory_space<vmem>>, %arg2: memref<25x2xbf16, #tpu.memory_space<vmem>>, %arg3: memref<25x1xf32, #tpu.memory_space<vmem>>, %arg4: memref<25x25xbf16, #tpu.memory_space<vmem>>, %arg5: memref<25x1xf32, #tpu.memory_space<vmem>>, %arg6: memref<25x25xbf16, #tpu.memory_space<vmem>>, %arg7: memref<25x1xf32, #tpu.memory_space<vmem>>, %arg8: memref<1x25xbf16, #tpu.memory_space<vmem>>, %arg9: memref<1x1xf32, #tpu.memory_space<vmem>>, %arg10: memref<1x128xf32, #tpu.memory_space<vmem>>) attributes {dimension_semantics = [#tpu.dimension_semantics<parallel>], iteration_bounds = array<i64: 1>, scalar_prefetch = 0 : i64, scratch_operands = 0 : i64, tpu.core_type = #tpu.core_type<tc>, window_params = [{transform_indices = @transform_0, window_bounds = array<i64: 2, 128>}, {pipeline_mode = #tpu.pipeline_mode<synchronous>, transform_indices = @transform_1, window_bounds = array<i64: 25, 2>}, {pipeline_mode = #tpu.pipeline_mode<synchronous>, transform_indices = @transform_2, window_bounds = array<i64: 25, 1>}, {pipeline_mode = #tpu.pipeline_mode<synchronous>, transform_indices = @transform_3, window_bounds = array<i64: 25, 25>}, {pipeline_mode = #tpu.pipeline_mode<synchronous>, transform_indices = @transform_4, window_bounds = array<i64: 25, 1>}, {pipeline_mode = #tpu.pipeline_mode<synchronous>, transform_indices = @transform_5, window_bounds = array<i64: 25, 25>}, {pipeline_mode = #tpu.pipeline_mode<synchronous>, transform_indices = @transform_6, window_bounds = array<i64: 25, 1>}, {pipeline_mode = #tpu.pipeline_mode<synchronous>, transform_indices = @transform_7, window_bounds = array<i64: 1, 25>}, {pipeline_mode = #tpu.pipeline_mode<synchronous>, transform_indices = @transform_8, window_bounds = array<i64: 1, 1>}, {transform_indices = @transform_9, window_bounds = array<i64: 1, 128>}]} {
    %c0 = arith.constant 0 : index
    %c0_0 = arith.constant 0 : index
    %0 = vector.load %arg1[%c0, %c0_0] : memref<2x128xbf16, #tpu.memory_space<vmem>>, vector<2x128xbf16>
    %1 = arith.extf %0 : vector<2x128xbf16> to vector<2x128xf32>
    %c0_1 = arith.constant 0 : index
    %c0_2 = arith.constant 0 : index
    %2 = vector.load %arg2[%c0_1, %c0_2] : memref<25x2xbf16, #tpu.memory_space<vmem>>, vector<25x2xbf16>
    %3 = arith.extf %2 : vector<25x2xbf16> to vector<25x2xf32>
    %4 = vector.extract_strided_slice %3 {offsets = [0, 0], sizes = [25, 1], strides = [1, 1]} : vector<25x2xf32> to vector<25x1xf32>
    %5 = vector.extract_strided_slice %1 {offsets = [0, 0], sizes = [1, 128], strides = [1, 1]} : vector<2x128xf32> to vector<1x128xf32>
    %6 = vector.broadcast %4 : vector<25x1xf32> to vector<25x128xf32>
    %7 = vector.broadcast %5 : vector<1x128xf32> to vector<25x128xf32>
    %8 = arith.mulf %6, %7 : vector<25x128xf32>
    %9 = vector.extract_strided_slice %3 {offsets = [0, 1], sizes = [25, 1], strides = [1, 1]} : vector<25x2xf32> to vector<25x1xf32>
    %10 = vector.extract_strided_slice %1 {offsets = [1, 0], sizes = [1, 128], strides = [1, 1]} : vector<2x128xf32> to vector<1x128xf32>
    %11 = vector.broadcast %9 : vector<25x1xf32> to vector<25x128xf32>
    %12 = vector.broadcast %10 : vector<1x128xf32> to vector<25x128xf32>
    %13 = arith.mulf %11, %12 : vector<25x128xf32>
    %14 = arith.addf %8, %13 : vector<25x128xf32>
    %c0_3 = arith.constant 0 : index
    %c0_4 = arith.constant 0 : index
    %15 = vector.load %arg3[%c0_3, %c0_4] : memref<25x1xf32, #tpu.memory_space<vmem>>, vector<25x1xf32>
    %16 = vector.broadcast %15 : vector<25x1xf32> to vector<25x128xf32>
    %17 = arith.addf %14, %16 : vector<25x128xf32>
    %cst = arith.constant 0.000000e+00 : f32
    %18 = vector.broadcast %cst : f32 to vector<25x128xf32>
    %19 = arith.maximumf %17, %18 : vector<25x128xf32>
    %c0_5 = arith.constant 0 : index
    %c0_6 = arith.constant 0 : index
    %20 = vector.load %arg4[%c0_5, %c0_6] : memref<25x25xbf16, #tpu.memory_space<vmem>>, vector<25x25xbf16>
    %21 = arith.truncf %19 : vector<25x128xf32> to vector<25x128xbf16>
    %cst_7 = arith.constant dense<0.000000e+00> : vector<25x128xf32>
    %22 = tpu.matmul %20, %21, %cst_7 {dimension_numbers = #tpu.dot_dimension_numbers<[1], [0], [0], [1], [0, 0, 1, 1], [], []>} : vector<25x25xbf16>, vector<25x128xbf16>, vector<25x128xf32> -> vector<25x128xf32>
    %c0_8 = arith.constant 0 : index
    %c0_9 = arith.constant 0 : index
    %23 = vector.load %arg5[%c0_8, %c0_9] : memref<25x1xf32, #tpu.memory_space<vmem>>, vector<25x1xf32>
    %24 = vector.broadcast %23 : vector<25x1xf32> to vector<25x128xf32>
    %25 = arith.addf %22, %24 : vector<25x128xf32>
    %cst_10 = arith.constant 0.000000e+00 : f32
    %26 = vector.broadcast %cst_10 : f32 to vector<25x128xf32>
    %27 = arith.maximumf %25, %26 : vector<25x128xf32>
    %c0_11 = arith.constant 0 : index
    %c0_12 = arith.constant 0 : index
    %28 = vector.load %arg6[%c0_11, %c0_12] : memref<25x25xbf16, #tpu.memory_space<vmem>>, vector<25x25xbf16>
    %29 = arith.truncf %27 : vector<25x128xf32> to vector<25x128xbf16>
    %cst_13 = arith.constant dense<0.000000e+00> : vector<25x128xf32>
    %30 = tpu.matmul %28, %29, %cst_13 {dimension_numbers = #tpu.dot_dimension_numbers<[1], [0], [0], [1], [0, 0, 1, 1], [], []>} : vector<25x25xbf16>, vector<25x128xbf16>, vector<25x128xf32> -> vector<25x128xf32>
    %c0_14 = arith.constant 0 : index
    %c0_15 = arith.constant 0 : index
    %31 = vector.load %arg7[%c0_14, %c0_15] : memref<25x1xf32, #tpu.memory_space<vmem>>, vector<25x1xf32>
    %32 = vector.broadcast %31 : vector<25x1xf32> to vector<25x128xf32>
    %33 = arith.addf %30, %32 : vector<25x128xf32>
    %cst_16 = arith.constant 0.000000e+00 : f32
    %34 = vector.broadcast %cst_16 : f32 to vector<25x128xf32>
    %35 = arith.maximumf %33, %34 : vector<25x128xf32>
    %c0_17 = arith.constant 0 : index
    %c0_18 = arith.constant 0 : index
    %36 = vector.load %arg8[%c0_17, %c0_18] : memref<1x25xbf16, #tpu.memory_space<vmem>>, vector<1x25xbf16>
    %37 = arith.truncf %35 : vector<25x128xf32> to vector<25x128xbf16>
    %cst_19 = arith.constant dense<0.000000e+00> : vector<1x128xf32>
    %38 = tpu.matmul %36, %37, %cst_19 {dimension_numbers = #tpu.dot_dimension_numbers<[1], [0], [0], [1], [0, 0, 1, 1], [], []>} : vector<1x25xbf16>, vector<25x128xbf16>, vector<1x128xf32> -> vector<1x128xf32>
    %c0_20 = arith.constant 0 : index
    %c0_21 = arith.constant 0 : index
    %39 = vector.load %arg9[%c0_20, %c0_21] : memref<1x1xf32, #tpu.memory_space<vmem>>, vector<1x1xf32>
    %40 = vector.broadcast %39 : vector<1x1xf32> to vector<1x128xf32>
    %41 = arith.addf %38, %40 : vector<1x128xf32>
    %42 = math.absf %41 : vector<1x128xf32>
    %cst_22 = arith.constant 0.000000e+00 : f32
    %43 = vector.broadcast %cst_22 : f32 to vector<1x128xf32>
    %44 = arith.subf %43, %42 : vector<1x128xf32>
    %45 = math.exp %44 : vector<1x128xf32>
    %cst_23 = arith.constant 1.000000e+00 : f32
    %46 = vector.broadcast %cst_23 : f32 to vector<1x128xf32>
    %47 = arith.addf %46, %45 : vector<1x128xf32>
    %48 = tpu.reciprocal %47 {approx = true} : vector<1x128xf32> -> vector<1x128xf32>
    %cst_24 = arith.constant 0.000000e+00 : f32
    %49 = vector.broadcast %cst_24 : f32 to vector<1x128xf32>
    %50 = arith.cmpf oge, %41, %49 : vector<1x128xf32>
    %51 = arith.mulf %45, %48 : vector<1x128xf32>
    %52 = arith.select %50, %48, %51 : vector<1x128xi1>, vector<1x128xf32>
    %c0_25 = arith.constant 0 : index
    %c0_26 = arith.constant 0 : index
    %53 = vector.load %arg10[%c0_25, %c0_26] : memref<1x128xf32, #tpu.memory_space<vmem>>, vector<1x128xf32>
    tpu.vector_store %arg10[%c0_25, %c0_26], %52 {strides = array<i32>} : memref<1x128xf32, #tpu.memory_space<vmem>>, vector<1x128xf32>,
    return
  }
  func.func @transform_0(%arg0: i32) -> (i32, i32) {
    %c0_i32 = arith.constant 0 : i32
    %c0_i32_0 = arith.constant 0 : i32
    return %c0_i32, %arg0 : i32, i32
  }
  func.func @transform_1(%arg0: i32) -> (i32, i32) {
    %c0_i32 = arith.constant 0 : i32
    %c0_i32_0 = arith.constant 0 : i32
    %c0_i32_1 = arith.constant 0 : i32
    return %c0_i32, %c0_i32_0 : i32, i32
  }
  func.func @transform_2(%arg0: i32) -> (i32, i32) {
    %c0_i32 = arith.constant 0 : i32
    %c0_i32_0 = arith.constant 0 : i32
    %c0_i32_1 = arith.constant 0 : i32
    return %c0_i32, %c0_i32_0 : i32, i32
  }
  func.func @transform_3(%arg0: i32) -> (i32, i32) {
    %c0_i32 = arith.constant 0 : i32
    %c0_i32_0 = arith.constant 0 : i32
    %c0_i32_1 = arith.constant 0 : i32
    return %c0_i32, %c0_i32_0 : i32, i32
  }
  func.func @transform_4(%arg0: i32) -> (i32, i32) {
    %c0_i32 = arith.constant 0 : i32
    %c0_i32_0 = arith.constant 0 : i32
    %c0_i32_1 = arith.constant 0 : i32
    return %c0_i32, %c0_i32_0 : i32, i32
  }
  func.func @transform_5(%arg0: i32) -> (i32, i32) {
    %c0_i32 = arith.constant 0 : i32
    %c0_i32_0 = arith.constant 0 : i32
    %c0_i32_1 = arith.constant 0 : i32
    return %c0_i32, %c0_i32_0 : i32, i32
  }
  func.func @transform_6(%arg0: i32) -> (i32, i32) {
    %c0_i32 = arith.constant 0 : i32
    %c0_i32_0 = arith.constant 0 : i32
    %c0_i32_1 = arith.constant 0 : i32
    return %c0_i32, %c0_i32_0 : i32, i32
  }
  func.func @transform_7(%arg0: i32) -> (i32, i32) {
    %c0_i32 = arith.constant 0 : i32
    %c0_i32_0 = arith.constant 0 : i32
    %c0_i32_1 = arith.constant 0 : i32
    return %c0_i32, %c0_i32_0 : i32, i32
  }
  func.func @transform_8(%arg0: i32) -> (i32, i32) {
    %c0_i32 = arith.constant 0 : i32
    %c0_i32_0 = arith.constant 0 : i32
    %c0_i32_1 = arith.constant 0 : i32
    return %c0_i32, %c0_i32_0 : i32, i32
  }
  func.func @transform_9(%arg0: i32) -> (i32, i32) {
    %c0_i32 = arith.constant 0 : i32
    %c0_i32_0 = arith.constant 0 : i32
    return %c0_i32, %arg0 : i32, i32
  }
}

</mosaic_0001>

<bundles_post_ra>
// kernel: tpu_custom_call.1
= control target key start
LH: loop header
LB: loop body
LE: loop exit
PB: predicated region body
PF: predicated region fallthrough
CT: control target
= control target key end

     0   :  { %s684_s0 = inlined_call_operand.vmem [shape: bf16[2,128], index: 0, kind: input, shape index: {}]   ;;  %s685_s1 = inlined_call_operand.vmem [shape: bf16[25,2], index: 1, kind: input, shape index: {}]   ;;  %s686_s2 = inlined_call_operand.vmem [shape: f32[25,1], index: 2, kind: input, shape index: {}]   ;;  %s687_s3 = inlined_call_operand.vmem [shape: bf16[25,25], index: 3, kind: input, shape index: {}]   ;;  %s688_s4 = inlined_call_operand.vmem [shape: f32[25,1], index: 4, kind: input, shape index: {}]   ;;  %s689_s5 = inlined_call_operand.vmem [shape: bf16[25,25], index: 5, kind: input, shape index: {}]   ;;  %s690_s6 = inlined_call_operand.vmem [shape: f32[25,1], index: 6, kind: input, shape index: {}]   ;;  %s691_s7 = inlined_call_operand.vmem [shape: bf16[1,25], index: 7, kind: input, shape index: {}]   ;;  %s692_s8 = inlined_call_operand.<no memory space> [shape: f32[1,1], index: 8, kind: input, shape index: {}]   ;;  %s693_s9 = inlined_call_operand.hbm [shape: f32[1,128], index: 9, kind: output, shape index: {}]  }
   0x1   :  { %v14_v0 = vstv %s692_s8 }
   0x2   :  { %15 = vst [vmem:[#allocation2] sm:$0x1] %v14_v0 }
   0x3   :  { %v40_v1 = vld [vmem:[%s685_s1 + $0x8] sm:$0xf]  ;;  %v41_v2 = vld [vmem:[%s685_s1 + $0xc] sm:$0x1]  ;;  %v537_v3 = vmov 1   ;;  %v538_v4 = vmov 0  }
   0x4   :  { %480 = vset.pattern.permute.xlu0 %v537_v3  ;;  %492 = vset.pattern.permute.xlu1 %v538_v4  ;;  %v44_v5 = vunpack.c.l.bf16 %v40_v1  ;;  %v45_v6 = vunpack.c.l.bf16 %v41_v2  ;;  %v436_v7 = vld [vmem:[%s685_s1] sm:$0xff]  }
   0x5   :  { %v437_v8 = vunpack.c.l.bf16 %v436_v7  ;;  %v438_v9 = vunpack.c.h.bf16 %v436_v7 }
   0x6   :  { %v493_v10 = vpack.i.bf16 %v45_v6, %v44_v5 }
   0x7   :  { %v481_v11 = vpack.i.bf16 %v438_v9, %v437_v8 }
   0x8   :  { %494 = vperm.xlu1 %492, %v493_v10  }
   0x9   :  { %482 = vperm.xlu0 %480, %v481_v11  }
   0xc   :  { %498 = vset.pattern.permute.xlu1 %v537_v3 }
   0xd   :  { %16 = vsyncpa [#allocation4], 0  ;;  %486 = vset.pattern.permute.xlu0 %v538_v4  ;;  %500 = vperm.xlu1 %498, %v493_v10   ;;  %v103_v12 = vld [vmem:[%s686_s2 + $0x8] sm:$0xff]  ;;  %v102_v13 = vld [vmem:[%s686_s2] sm:$0xff]  ;;  %vm174_vm0 = vcmask 203776   ;;  %v66_v26 = vlaneseq  ;;  %vm181_vm1 = vcmask 1043456  }
   0xe   :  { %488 = vperm.xlu0 %486, %v481_v11   ;;  %v140_v14 = vld [vmem:[%s688_s4] sm:$0xff]  ;;  %v104_v15 = vld [vmem:[%s686_s2 + $0x10] sm:$0xff]  ;;  %v105_v17 = vld [vmem:[%s686_s2 + $0x18] sm:$0x1]  ;;  %vm182_vm2 = vcmask 1044480   ;;  %v539_v5 = vmov 65535  }
   0xf   :  { %v142_v16 = vld [vmem:[%s688_s4 + $0x10] sm:$0xff]  ;;  %v247_v18 = vld [vmem:[%s690_s6] sm:$0xff]  ;;  %v141_v19 = vld [vmem:[%s688_s4 + $0x8] sm:$0xff]  ;;  %v645_v27 = vshrl.u32 %v66_v26, 7  ;;  %v183_v6 = vsel %vm181_vm1, 4294967295, %v539_v5  ;;  %vm541_vm3 = vmmov 0  }
  0x10   :  { %v249_v20 = vld [vmem:[%s690_s6 + $0x10] sm:$0xff]  ;;  %v143_v21 = vld [vmem:[%s688_s4 + $0x18] sm:$0x1]  ;;  %v346_v22 = vld [vmem:[#allocation2] sm:$0x1]  ;;  %v184_v9 = vsel %vm182_vm2, %v183_v6, 0 }
  0x11   :  { %504 = vset.pattern.permute.xlu1 %v538_v4  ;;  %v248_v23 = vld [vmem:[%s690_s6 + $0x8] sm:$0xff]  ;;  %v505_v24 = vld [vmem:[%s687_s3] sm:$0xff]   ;;  %v250_v25 = vld [vmem:[%s690_s6 + $0x18] sm:$0x1]  ;;  %v92_v29 = vsub.s32 1, %v645_v27  ;;  %v68_v33 = vsub.s32 0, %v645_v27 }
  0x12   :  { %113 = vperm.xlu0 %486, %v103_v12   ;;  %108 = vperm.xlu1 %504, %v102_v13   ;;  %v36_v28 = vld [vmem:[%s684_s0] sm:$0x1]  ;;  %v506_v12 = vld [vmem:[%s687_s3 + $0x8] sm:$0x1f]   ;;  %s542_s22 = smov [#allocation3]  }
  0x13   :  { %454 = vmatprep.mubr.msk.bf16.mxu0 %vm174_vm0, %v505_v24  ;;  %v37_v31 = vunpack.c.l.bf16 %v36_v28  ;;  %v507_v13 = vld [vmem:[%s689_s5] sm:$0xff]  }
  0x14   :  { %462 = vmatprep.mubr.msk.bf16.mxu1 %vm174_vm0, %v507_v13 }
  0x15   :  { %v93_v35 = vrot.slane %v37_v31, %v92_v29  ;;  %v69_v38 = vrot.slane %v37_v31, %v68_v33 }
  0x16   :  { %146 = vperm.xlu0 %486, %v140_v14   ;;  %118 = vperm.xlu1 %504, %v104_v15  }
  0x1a   :  { %156 = vperm.xlu0 %486, %v142_v16   ;;  %123 = vperm.xlu1 %504, %v105_v17  }
  0x1e   :  { %253 = vperm.xlu0 %486, %v247_v18   ;;  %151 = vperm.xlu1 %504, %v141_v19  }
  0x22   :  { %263 = vperm.xlu0 %486, %v249_v20   ;;  %161 = vperm.xlu1 %504, %v143_v21  }
  0x26   :  { %349 = vperm.xlu0 %486, %v346_v22   ;;  %258 = vperm.xlu1 %504, %v248_v23  }
  0x2a   :  { %268 = vperm.xlu1 %504, %v250_v25  }
  0x87   :  { %v495_v30 = vpop.permute.xlu1 %494 }
  0x88   :  { %v483_v32 = vpop.permute.xlu0 %482  ;;  %v496_v45 = vunpack.i.l.bf16 %v495_v30  ;;  %v497_v50 = vunpack.i.h.bf16 %v495_v30 }
  0x89   :  { %v484_v34 = vunpack.i.l.bf16 %v483_v32  ;;  %v485_v36 = vunpack.i.h.bf16 %v483_v32 }
  0x8a   :  { %v72_v55 = vmul.f32 %v496_v45, %v69_v38  ;;  %v73_v60 = vmul.f32 %v497_v50, %v69_v38 }
  0x8b   :  { %v94_v39 = vmul.f32 %v484_v34, %v93_v35  ;;  %v95_v41 = vmul.f32 %v485_v36, %v93_v35  ;;  %v540_v36 = vmov 0.0  }
  0x8c   :  { %v501_v37 = vpop.permute.xlu1 %500 }
  0x8d   :  { %v489_v40 = vpop.permute.xlu0 %488  ;;  %v502_v42 = vunpack.i.l.bf16 %v501_v37  ;;  %v503_v46 = vunpack.i.h.bf16 %v501_v37 }
  0x8e   :  { %v491_v43 = vunpack.i.h.bf16 %v489_v40  ;;  %v490_v44 = vunpack.i.l.bf16 %v489_v40 }
  0x8f   :  { %v96_v51 = vmul.f32 %v502_v42, %v93_v35  ;;  %v97_v56 = vmul.f32 %v503_v46, %v93_v35  ;;  %v508_v35 = vld [vmem:[%s689_s5 + $0x8] sm:$0x1f]  }
  0x90   :  { %v70_v47 = vmul.f32 %v490_v44, %v69_v38  ;;  %v71_v48 = vmul.f32 %v491_v43, %v69_v38 }
  0x91   :  { %v109_v49 = vpop.permute.xlu1 %108  ;;  %v114_v54 = vpop.permute.xlu0 %113  ;;  %v100_v63 = vadd.f32 %v96_v51, %v72_v55  ;;  %v101_v1 = vadd.f32 %v97_v56, %v73_v60  ;;  %v343_v56 = vld [vmem:[%s691_s7] sm:$0x1]  ;;  %s418_s7 = sshll.u32 %s542_s22, 4  ;;  %s419_s7 = int_to_ptr.vmem [resolvable:$true] %s418_s7 }
  0x92   :  { %v99_v52 = vadd.f32 %v95_v41, %v71_v48  ;;  %v98_v53 = vadd.f32 %v94_v39, %v70_v47  ;;  %s513_s23 = scalar_lea.vmem %s419_s7, 16  ;;  %s517_s24 = scalar_lea.vmem %s419_s7, 32 }
  0x93   :  { %p514_p0 = scmp.ne.s32.totalorder %s419_s7, %s513_s23  ;;  %p518_p1 = scmp.lt.s32.totalorder %s419_s7, %s419_s7 }
  0x94   :  { %v127_v57 = vadd.f32 %v114_v54, %v99_v52  ;;  %v126_v58 = vadd.f32 %v109_v49, %v98_v53  ;;  %p519_p2 = scmp.lt.s32.totalorder %s517_s24, %s513_s23 }
  0x95   :  { %v119_v59 = vpop.permute.xlu1 %118  ;;  %v147_v14 = vpop.permute.xlu0 %146 }
  0x96   :  { %v131_v61 = vmax.f32 %v127_v57, 0.0  ;;  %v130_v62 = vmax.f32 %v126_v58, 0.0  ;;  %v128_v0 = vadd.f32 %v119_v59, %v100_v63  ;;  %p520_p3 = por %p519_p2, %p518_p1 }
  0x98   :  { %v138_v2 = vpack.c.bf16 %v131_v61, %v130_v62  ;;  %v132_v7 = vmax.f32 %v128_v0, 0.0  ;;  %p521_p4 = pnand %p520_p3, %p514_p0 }
  0x99   :  { %v124_v3 = vpop.permute.xlu1 %123  ;;  %v157_v16 = vpop.permute.xlu0 %156 }
  0x9a   :  { %v129_v4 = vadd.f32 %v124_v3, %v101_v1  ;;  %450 = vmatprep.subr.bf16.mxu0 %v138_v2 }
  0x9b   :  { %451 = vmatpush3.bf16.msra.mxu0 %v138_v2 }
  0x9c   :  { %v133_v8 = vmax.f32 %v129_v4, 0.0 }
  0x9d   :  { %v152_v15 = vpop.permute.xlu1 %151  ;;  %v254_v37 = vpop.permute.xlu0 %253 }
  0x9e   :  { %v139_v10 = vpack.c.bf16 %v133_v8, %v132_v7 }
  0xa0   :  { %v186_v11 = vand.u32 %v184_v9, %v139_v10 }
  0xa1   :  { %v162_v20 = vpop.permute.xlu1 %161  ;;  %v264_v39 = vpop.permute.xlu0 %263 }
  0xa2   :  { %452 = vmatprep.subr.bf16.mxu0 %v186_v11 }
  0xa3   :  { %453 = vmatpush3.bf16.msra.mxu0 %v186_v11 }
  0xa4   :  { %466 = vmatprep.subr.bf16.mxu0 %v540_v36 }
  0xa5   :  { %v259_v38 = vpop.permute.xlu1 %258  ;;  %v350_v57 = vpop.permute.xlu0 %349 }
  0xa6   :  { %455 = vmatmul.mubr.msk.bf16.vlgmr.msra.gmra.mrb[0].mxu0 %vm174_vm0, %v506_v12  ;;  %v355_v58 = vrot.slane %v350_v57, %v68_v33 }
  0xa7   :  { %470 = vmatprep.mubr.msk.bf16.mxu0 %vm541_vm3, %v540_v36 }
  0xa9   :  { %v269_v43 = vpop.permute.xlu1 %268 }
 0x179   :  { %v456_v17 = vpop.f32.mrb[0].mxu0 }
 0x17a   :  { %v231_v18 = vadd.f32 %v456_v17, %v157_v16  ;;  %v222_v19 = vpop.f32.mrb[1].mxu0 }
 0x17b   :  { %v223_v21 = vadd.f32 %v222_v19, %v147_v14  ;;  %v457_v22 = vpop.f32.mrb[2].mxu0 }
 0x17c   :  { %v234_v23 = vadd.f32 %v457_v22, %v162_v20  ;;  %v225_v24 = vpop.f32.mrb[3].mxu0  ;;  %v239_v26 = vmax.f32 %v231_v18, 0.0 }
 0x17d   :  { %v226_v25 = vadd.f32 %v225_v24, %v152_v15  ;;  %v237_v29 = vmax.f32 %v223_v21, 0.0 }
 0x17e   :  { %v240_v28 = vmax.f32 %v234_v23, 0.0 }
 0x17f   :  { %v238_v30 = vmax.f32 %v226_v25, 0.0 }
 0x180   :  { %v246_v31 = vpack.c.bf16 %v240_v28, %v239_v26 }
 0x181   :  { %v245_v32 = vpack.c.bf16 %v238_v30, %v237_v29 }
 0x182   :  { %v288_v34 = vand.u32 %v246_v31, %v184_v9 }
 0x183   :  { %458 = vmatprep.subr.bf16.mxu1 %v245_v32 }
 0x184   :  { %459 = vmatpush3.bf16.msra.mxu1 %v245_v32 }
 0x185   :  { %460 = vmatprep.subr.bf16.mxu1 %v288_v34 }
 0x188   :  { %461 = vmatpush3.bf16.msra.mxu1 %v288_v34 }
 0x18b   :  { %463 = vmatmul.mubr.msk.bf16.vlgmr.msra.gmra.mrb[0].mxu1 %vm174_vm0, %v508_v35 }
 0x25e   :  { %v464_v40 = vpop.f32.mrb[0].mxu1 }
 0x25f   :  { %v333_v41 = vadd.f32 %v464_v40, %v264_v39  ;;  %v324_v42 = vpop.f32.mrb[1].mxu1 }
 0x260   :  { %v325_v44 = vadd.f32 %v324_v42, %v254_v37  ;;  %v465_v45 = vpop.f32.mrb[2].mxu1 }
 0x261   :  { %v336_v46 = vadd.f32 %v465_v45, %v269_v43  ;;  %v327_v47 = vpop.f32.mrb[3].mxu1  ;;  %v341_v49 = vmax.f32 %v333_v41, 0.0 }
 0x262   :  { %v328_v48 = vadd.f32 %v327_v47, %v259_v38  ;;  %v339_v51 = vmax.f32 %v325_v44, 0.0 }
 0x263   :  { %v342_v50 = vmax.f32 %v336_v46, 0.0 }
 0x264   :  { %v340_v52 = vmax.f32 %v328_v48, 0.0 }
 0x265   :  { %v345_v53 = vpack.c.bf16 %v342_v50, %v341_v49 }
 0x266   :  { %v344_v54 = vpack.c.bf16 %v340_v52, %v339_v51 }
 0x267   :  { %v360_v55 = vand.u32 %v345_v53, %v184_v9 }
 0x268   :  { %467 = vmatpush3.bf16.msra.mxu0 %v344_v54 }
 0x269   :  { %468 = vmatprep.subr.bf16.mxu0 %v540_v36 }
 0x26c   :  { %469 = vmatpush3.bf16.msra.mxu0 %v360_v55 }
 0x26f   :  { %471 = vmatmul.mubr.msk.bf16.vlgmr.msra.gmra.mrb[4].mxu0 %vm174_vm0, %v343_v56 }
 0x342   :  { %v396_v59 = vpop.f32.mrb[4].mxu0 }
 0x343   :  { %v397_v60 = vadd.f32 %v396_v59, %v355_v58  ;;  %v472_v61 = vpop.f32.mrb[5].mxu0 }
 0x344   :  { %v399_v62 = vpop.f32.mrb[6].mxu0 }
 0x345   :  { %v402_v63 = vand.u32 2147483647, %v397_v60  ;;  %v473_v0 = vpop.f32.mrb[7].mxu0  ;;  %vm408_vm4 = vcmp.ge.f32.partialorder %v397_v60, 0.0 }
 0x347   :  { %v403_v1 = vsub.f32 0.0, %v402_v63 }
 0x349   :  { %v404_v2 = vmul.f32 1.442695, %v403_v1 }
 0x34b   :  { %509 = vpow2.f32 %v404_v2 }
 0x355   :  { %v510_v3 = vpop.eup %509 }
 0x356   :  { %v406_v4 = vadd.f32 1.0, %v510_v3 }
 0x358   :  { %511 = vrcp.f32 %v406_v4 }
 0x362   :  { %v512_v5 = vpop.eup %511 }
 0x363   :  { %v409_v6 = vmul.f32 %v512_v5, %v510_v3 }
 0x365   :  { %v410_v27 = vsel %vm408_vm4, %v512_v5, %v409_v6 }
 0x366   :  { %411 = vst [vmem:[#allocation3] sm:$0x1] %v410_v27 }
 0x367   :  { %524 = shalt.err (!%p521_p4)
}
 0x368   :  { %s525_s27 = scalar_lea.hbm %s693_s9, 16 }
 0x369   :  { %p526_p5 = scmp.ne.s32.totalorder %s693_s9, %s525_s27  ;;  %p529_p6 = scmp.lt.u32.totalorder %s525_s27, %s693_s9 }
 0x36b   :  { %p531_p7 = pnand %p529_p6, %p526_p5 }
 0x36d   :  { %534 = shalt.err (!%p531_p7)
}
 0x36e   :  { %421 = dma.vmem_to_hbm [thread:$0]  %s419_s7, 16, %s693_s9, [#allocation4]  }
 0x36f   :  { %535 = dma.done.wait [#allocation4], 16  }
 0x370   :  { %536 = vsyncadd [#allocation4], 4294967280 }
 0x371   :  { %425 = vsyncpa [#allocation4], 1 }

</bundles_post_ra>
